<compile_context>
chip_gen: v5e
topology: v5e:2x2
jax: 0.10.0
libtpu: 0.0.40
codegen_flags: <defaults>
</compile_context>

<pallas_src>
import jax
import jax.numpy as jnp
from jax.experimental import pallas as pl
from jax.experimental.pallas import tpu as pltpu

LANE = 128
SUBLANE = 8
DEFAULT_TILE_B = 1024          # batch rows per grid step (upper bound; budget-capped)
_MIB = 1024 * 1024


def _round_up(x, m):
    return (x + m - 1) // m * m


def _vmem_limit_bytes():
    """Per-generation scoped-VMEM budget with headroom (v7x: ~45 MiB, v5e/v6e: ~90 MiB)."""
    try:
        cap = int(pltpu.get_tpu_info().vmem_capacity_bytes)
        return max(32 * _MIB, min(96 * _MIB, int(cap * 0.7)))
    except Exception:
        return 32 * _MIB          # conservative fallback, valid on every generation


def net_share_kernel(x_ref, *rest):
    """rest = (w0, b0, w1, b1, ..., w_{L-1}, b_{L-1}, out_ref).

    Weights are bf16 (in, out); biases f32 (1, out).  Per layer:
        h = relu( (h_bf16 @ W_bf16)_f32acc + b_f32 )
    Eval-mode dropout is the identity.
    """
    out_ref = rest[-1]
    wb = rest[:-1]
    n_layers = len(wb) // 2

    h = x_ref[...].astype(jnp.float32)
    for li in range(n_layers):
        w = wb[2 * li][...]                                   # bf16 (in_pad, out_pad)
        b = wb[2 * li + 1][...].astype(jnp.float32)           # f32  (1, out_pad)
        z = jnp.dot(h.astype(w.dtype), w,
                    preferred_element_type=jnp.float32) + b   # MXU, f32 accumulate
        h = jnp.maximum(z, 0.0)                               # ReLU; dropout(eval) = id
    out_ref[...] = h.astype(out_ref.dtype)


def net_share_forward(x, weights, biases, *, tile_b=DEFAULT_TILE_B):
    """x: (B, fea_dim) f32.  weights[i]: (in_i, out_i) (bf16 or f32), biases[i]: (1, out_i).

    Pass only the layers Net_share.forward actually applies (see used_layers).
    Returns (B, out_dim) f32.
    """
    B, fea_dim = x.shape
    out_dim = int(weights[-1].shape[1])

    # --- lane-dense padding: features padded to multiples of 128 ---------------
    fea_pad = _round_up(fea_dim, LANE)
    w_pads, b_pads = [], []
    in_pad = fea_pad
    for w, b in zip(weights, biases):
        fi, fo = int(w.shape[0]), int(w.shape[1])
        out_pad = _round_up(fo, LANE)
        wp = jnp.zeros((in_pad, out_pad), jnp.bfloat16).at[:fi, :fo].set(
            w.astype(jnp.bfloat16))
        bp = jnp.zeros((1, out_pad), jnp.float32).at[:, :fo].set(
            b.astype(jnp.float32))
        w_pads.append(wp)
        b_pads.append(bp)
        in_pad = out_pad
    out_pad = in_pad
    xp = jnp.pad(x.astype(jnp.float32), ((0, 0), (0, fea_pad - fea_dim)))

    # --- VMEM budget: weights resident, activations tiled over batch -----------
    vmem_limit = _vmem_limit_bytes()
    wb_bytes = sum(int(a.size) * a.dtype.itemsize for a in (w_pads + b_pads))
    resident_bytes = 2 * wb_bytes            # worst case (double-buffered constants)
    budget = int(vmem_limit * 0.8) - resident_bytes
    if budget <= 0:
        # TODO(synk): stream oversized weights over an N/K grid axis instead of residency.
        raise ValueError("Net_share weights too large to keep VMEM-resident on this chip")
    max_hid = max(int(wp.shape[1]) for wp in w_pads)
    bytes_per_row = (3 * fea_pad * 4          # x: up to triple-buffered, f32
                     + 2 * out_pad * 4        # out: double-buffered, f32
                     + 2 * max_hid * 4)       # in-kernel f32 intermediates headroom
    tile_budget = max(SUBLANE, (budget // bytes_per_row) // SUBLANE * SUBLANE)

    # >= 2 grid steps when the batch allows it, so v7x megacore can shard the axis.
    half_b = _round_up(pl.cdiv(B, 2), SUBLANE)
    tile_b = max(SUBLANE,
                 min(tile_b, tile_budget, half_b, _round_up(B, SUBLANE)))
    grid = (pl.cdiv(B, tile_b),)

    flops = 2 * B * sum(int(w.shape[0]) * int(w.shape[1]) for w in w_pads)
    bytes_accessed = int(xp.size * xp.dtype.itemsize + wb_bytes + B * out_pad * 4)
    cost = pl.CostEstimate(flops=flops, transcendentals=0,
                           bytes_accessed=bytes_accessed)

    def _run(use_pipeline_mode):
        def spec(shape, index_map, nbuf):
            if use_pipeline_mode:
                return pl.BlockSpec(shape, index_map,
                                    pipeline_mode=pl.Buffered(nbuf))
            return pl.BlockSpec(shape, index_map)

        in_specs = [spec((tile_b, fea_pad), lambda i: (i, 0), 3)]   # deep input pipeline
        operands = [xp]
        for wp, bp in zip(w_pads, b_pads):
            # Constant index_map -> VMEM-resident across grid steps; single-buffered.
            in_specs.append(spec(wp.shape, lambda i: (0, 0), 1))
            operands.append(wp)
            in_specs.append(spec(bp.shape, lambda i: (0, 0), 1))
            operands.append(bp)

        return pl.pallas_call(
            net_share_kernel,
            out_shape=jax.ShapeDtypeStruct((B, out_pad), jnp.float32),
            grid=grid,
            in_specs=in_specs,
            out_specs=pl.BlockSpec((tile_b, out_pad), lambda i: (i, 0)),
            compiler_params=pltpu.CompilerParams(
                dimension_semantics=("parallel",),
                vmem_limit_bytes=vmem_limit,
            ),
            cost_estimate=cost,
        )(*operands)

    try:
        y = jax.block_until_ready(_run(True))
    except Exception:
        # pipeline_mode / Buffered(1|3) unsupported on this jax build -> default buffering.
        y = jax.block_until_ready(_run(False))

    return y[:, :out_dim]


def init_net_share_params(key, fea_dim, hid_dim, n_in):
    """Mirrors the module: n_in Linear layers; fc[0]: fea->hid, rest hid->hid.

    Weights are stored (in, out) (transposed vs PyTorch) and pre-cast to bf16
    for the MXU; biases stay f32.  Init follows nn.Linear's default
    U(-1/sqrt(fan_in), 1/sqrt(fan_in)).
    """
    dims = [(fea_dim, hid_dim)] + [(hid_dim, hid_dim)] * (n_in - 1)
    keys = jax.random.split(key, 2 * n_in)
    weights, biases = [], []
    for li, (fi, fo) in enumerate(dims):
        bound = float(fi) ** -0.5
        w = jax.random.uniform(keys[2 * li], (fi, fo), jnp.float32, -bound, bound)
        b = jax.random.uniform(keys[2 * li + 1], (1, fo), jnp.float32, -bound, bound)
        weights.append(w.astype(jnp.bfloat16))
        biases.append(b)
    return weights, biases


def used_layers(weights, biases):
    """Net_share.forward applies fc[0] then fc[1..n_in-2]; the last Linear is
    constructed but never used (its loop stops at len(fc)-1)."""
    n_in = len(weights)
    n_used = max(1, n_in - 1)
    return tuple(weights[:n_used]), tuple(biases[:n_used])


def reference_forward(x, weights, biases):
    """Emulates the kernel numerics (bf16 operands, f32 accumulate, f32 bias+ReLU)."""
    h = x.astype(jnp.float32)
    for w, b in zip(weights, biases):
        hb = h.astype(jnp.bfloat16).astype(jnp.float32)
        wf = w.astype(jnp.bfloat16).astype(jnp.float32)
        h = jnp.maximum(hb @ wf + b.astype(jnp.float32), 0.0)
    return h


if __name__ == "__main__":
    B, FEA, HID, N_IN, DROPOUT = 8, 16, 32, 3, 0.5   # eval-mode dropout => identity
    key = jax.random.PRNGKey(0)
    kx, kp = jax.random.split(key)

    x = jax.random.normal(kx, (B, FEA), dtype=jnp.float32)
    all_w, all_b = init_net_share_params(kp, FEA, HID, N_IN)
    w_used, b_used = used_layers(all_w, all_b)        # fc[0], fc[1]; fc[2] never applied

    y = net_share_forward(x, w_used, b_used)
    y = jax.block_until_ready(y)

    y_ref = reference_forward(x, w_used, b_used)
    assert y.shape == (B, HID)
    assert jnp.allclose(y, y_ref, atol=1e-3, rtol=1e-3), float(jnp.max(jnp.abs(y - y_ref)))

    print("KERNEL_OK")
</pallas_src>

<mosaic_0001>
module attributes {stable_mosaic.version = 11 : i64} {
  func.func @net_share_kernel(%arg0: i32, %arg1: memref<8x128xf32, #tpu.memory_space<vmem>>, %arg2: memref<128x128xbf16, #tpu.memory_space<vmem>>, %arg3: memref<1x128xf32, #tpu.memory_space<vmem>>, %arg4: memref<128x128xbf16, #tpu.memory_space<vmem>>, %arg5: memref<1x128xf32, #tpu.memory_space<vmem>>, %arg6: memref<8x128xf32, #tpu.memory_space<vmem>>) attributes {dimension_semantics = [#tpu.dimension_semantics<parallel>], iteration_bounds = array<i64: 1>, scalar_prefetch = 0 : i64, scratch_operands = 0 : i64, tpu.core_type = #tpu.core_type<tc>, window_params = [{transform_indices = @transform_0, window_bounds = array<i64: 8, 128>}, {pipeline_mode = #tpu.pipeline_mode<synchronous>, transform_indices = @transform_1, window_bounds = array<i64: 128, 128>}, {pipeline_mode = #tpu.pipeline_mode<synchronous>, transform_indices = @transform_2, window_bounds = array<i64: 1, 128>}, {pipeline_mode = #tpu.pipeline_mode<synchronous>, transform_indices = @transform_3, window_bounds = array<i64: 128, 128>}, {pipeline_mode = #tpu.pipeline_mode<synchronous>, transform_indices = @transform_4, window_bounds = array<i64: 1, 128>}, {transform_indices = @transform_5, window_bounds = array<i64: 8, 128>}]} {
    %c0 = arith.constant 0 : index
    %c0_0 = arith.constant 0 : index
    %0 = vector.load %arg1[%c0, %c0_0] : memref<8x128xf32, #tpu.memory_space<vmem>>, vector<8x128xf32>
    %c0_1 = arith.constant 0 : index
    %c0_2 = arith.constant 0 : index
    %1 = vector.load %arg2[%c0_1, %c0_2] : memref<128x128xbf16, #tpu.memory_space<vmem>>, vector<128x128xbf16>
    %c0_3 = arith.constant 0 : index
    %c0_4 = arith.constant 0 : index
    %2 = vector.load %arg3[%c0_3, %c0_4] : memref<1x128xf32, #tpu.memory_space<vmem>>, vector<1x128xf32>
    %3 = arith.truncf %0 : vector<8x128xf32> to vector<8x128xbf16>
    %cst = arith.constant dense<0.000000e+00> : vector<8x128xf32>
    %4 = tpu.matmul %3, %1, %cst {dimension_numbers = #tpu.dot_dimension_numbers<[1], [0], [0], [1], [0, 0, 1, 1], [], []>} : vector<8x128xbf16>, vector<128x128xbf16>, vector<8x128xf32> -> vector<8x128xf32>
    %5 = vector.broadcast %2 : vector<1x128xf32> to vector<8x128xf32>
    %6 = arith.addf %4, %5 : vector<8x128xf32>
    %cst_5 = arith.constant 0.000000e+00 : f32
    %7 = vector.broadcast %cst_5 : f32 to vector<8x128xf32>
    %8 = arith.maximumf %6, %7 : vector<8x128xf32>
    %c0_6 = arith.constant 0 : index
    %c0_7 = arith.constant 0 : index
    %9 = vector.load %arg4[%c0_6, %c0_7] : memref<128x128xbf16, #tpu.memory_space<vmem>>, vector<128x128xbf16>
    %c0_8 = arith.constant 0 : index
    %c0_9 = arith.constant 0 : index
    %10 = vector.load %arg5[%c0_8, %c0_9] : memref<1x128xf32, #tpu.memory_space<vmem>>, vector<1x128xf32>
    %11 = arith.truncf %8 : vector<8x128xf32> to vector<8x128xbf16>
    %cst_10 = arith.constant dense<0.000000e+00> : vector<8x128xf32>
    %12 = tpu.matmul %11, %9, %cst_10 {dimension_numbers = #tpu.dot_dimension_numbers<[1], [0], [0], [1], [0, 0, 1, 1], [], []>} : vector<8x128xbf16>, vector<128x128xbf16>, vector<8x128xf32> -> vector<8x128xf32>
    %13 = vector.broadcast %10 : vector<1x128xf32> to vector<8x128xf32>
    %14 = arith.addf %12, %13 : vector<8x128xf32>
    %cst_11 = arith.constant 0.000000e+00 : f32
    %15 = vector.broadcast %cst_11 : f32 to vector<8x128xf32>
    %16 = arith.maximumf %14, %15 : vector<8x128xf32>
    %c0_12 = arith.constant 0 : index
    %c0_13 = arith.constant 0 : index
    %17 = vector.load %arg6[%c0_12, %c0_13] : memref<8x128xf32, #tpu.memory_space<vmem>>, vector<8x128xf32>
    tpu.vector_store %arg6[%c0_12, %c0_13], %16 {strides = array<i32>} : memref<8x128xf32, #tpu.memory_space<vmem>>, vector<8x128xf32>,
    return
  }
  func.func @transform_0(%arg0: i32) -> (i32, i32) {
    %c0_i32 = arith.constant 0 : i32
    %c0_i32_0 = arith.constant 0 : i32
    return %arg0, %c0_i32 : i32, i32
  }
  func.func @transform_1(%arg0: i32) -> (i32, i32) {
    %c0_i32 = arith.constant 0 : i32
    %c0_i32_0 = arith.constant 0 : i32
    %c0_i32_1 = arith.constant 0 : i32
    return %c0_i32, %c0_i32_0 : i32, i32
  }
  func.func @transform_2(%arg0: i32) -> (i32, i32) {
    %c0_i32 = arith.constant 0 : i32
    %c0_i32_0 = arith.constant 0 : i32
    %c0_i32_1 = arith.constant 0 : i32
    return %c0_i32, %c0_i32_0 : i32, i32
  }
  func.func @transform_3(%arg0: i32) -> (i32, i32) {
    %c0_i32 = arith.constant 0 : i32
    %c0_i32_0 = arith.constant 0 : i32
    %c0_i32_1 = arith.constant 0 : i32
    return %c0_i32, %c0_i32_0 : i32, i32
  }
  func.func @transform_4(%arg0: i32) -> (i32, i32) {
    %c0_i32 = arith.constant 0 : i32
    %c0_i32_0 = arith.constant 0 : i32
    %c0_i32_1 = arith.constant 0 : i32
    return %c0_i32, %c0_i32_0 : i32, i32
  }
  func.func @transform_5(%arg0: i32) -> (i32, i32) {
    %c0_i32 = arith.constant 0 : i32
    %c0_i32_0 = arith.constant 0 : i32
    return %arg0, %c0_i32 : i32, i32
  }
}

</mosaic_0001>

<bundles_post_ra>
// kernel: tpu_custom_call.1
= control target key start
LH: loop header
LB: loop body
LE: loop exit
PB: predicated region body
PF: predicated region fallthrough
CT: control target
= control target key end

     0   :  { %10 = vsyncpa [#allocation3], 0  ;;  %s496_s0 = inlined_call_operand.hbm [shape: f32[8,128], index: 0, kind: input, shape index: {}]   ;;  %s497_s1 = inlined_call_operand.hbm [shape: bf16[128,128], index: 1, kind: input, shape index: {}]   ;;  %s498_s2 = inlined_call_operand.vmem [shape: f32[1,128], index: 2, kind: input, shape index: {}]   ;;  %s499_s3 = inlined_call_operand.hbm [shape: bf16[128,128], index: 3, kind: input, shape index: {}]   ;;  %s500_s4 = inlined_call_operand.vmem [shape: f32[1,128], index: 4, kind: input, shape index: {}]   ;;  %s501_s5 = inlined_call_operand.hbm [shape: f32[8,128], index: 5, kind: output, shape index: {}]  }
   0x1   :  { %11 = vsyncpa [#allocation6], 0  ;;  %s28_s20 = sshll.u32 %s497_s1, 4  ;;  %s29_s20 = int_to_ptr.hbm [resolvable:$true] %s28_s20 }
   0x2   :  { %12 = vsyncpa [#allocation4], 0  ;;  %s442_s21 = smov [#allocation5]   ;;  %s18_s25 = sshll.u32 %s496_s0, 4  ;;  %s19_s25 = int_to_ptr.hbm [resolvable:$true] %s18_s25 }
   0x3   :  { %s30_s22 = sshll.u32 %s442_s21, 4  ;;  %s443_s26 = smov 64   ;;  %s31_s22 = int_to_ptr.vmem [resolvable:$true] %s30_s22 }
   0x4   :  { %s444_s27 = smov 4   ;;  %s445_s28 = smov [#allocation2]  }
   0x5   :  { %36 = dma.hbm_to_vmem [thread:$0]  %s29_s20, 1024, %s31_s22, [#allocation6], %s443_s26, %s443_s26, %s444_s27  }
   0x6   :  { %s20_s29 = sshll.u32 %s445_s28, 4  ;;  %s43_s7 = sshll.u32 %s499_s3, 4  ;;  %s21_s29 = int_to_ptr.vmem [resolvable:$true] %s20_s29  ;;  %s44_s7 = int_to_ptr.hbm [resolvable:$true] %s43_s7 }
   0x7   :  { %23 = dma.hbm_to_vmem [thread:$0]  %s19_s25, 128, %s21_s29, [#allocation3]  }
   0x8   :  { %s446_s1 = smov [#allocation7]  }
   0x9   :  { %s45_s8 = sshll.u32 %s446_s1, 4  ;;  %s46_s8 = int_to_ptr.vmem [resolvable:$true] %s45_s8 }
   0xa   :  { %51 = dma.hbm_to_vmem [thread:$0]  %s44_s7, 1024, %s46_s8, [#allocation6], %s443_s26, %s443_s26, %s444_s27  }
   0xb   :  { %436 = dma.done.wait [#allocation3], 128  }
   0xc   :  { %437 = vsyncadd [#allocation3], 4294967168 }
   0xd   :  { %438 = dma.done.wait [#allocation6], 2048  }
   0xe   :  { %439 = vsyncadd [#allocation6], 4294965248  ;;  %v323_v0 = vld [vmem:[#allocation5 + $0x38] sm:$0xff]  ;;  %v322_v1 = vld [vmem:[#allocation5 + $0x30] sm:$0xff]  ;;  %s447_s11 = smov [#allocation8]   ;;  %s241_s15 = sshll.u32 %s501_s5, 4  ;;  %s242_s15 = int_to_ptr.hbm [resolvable:$true] %s241_s15 }
   0xf   :  { %136 = vmatpush.bf16.msra.mxu0 %v323_v0  ;;  %v331_v2 = vld [vmem:[#allocation7 + $0x38] sm:$0xff]  ;;  %v330_v3 = vld [vmem:[#allocation7 + $0x30] sm:$0xff]  ;;  %v321_v4 = vld [vmem:[#allocation5 + $0x28] sm:$0xff]  ;;  %s239_s12 = sshll.u32 %s447_s11, 4  ;;  %s240_s12 = int_to_ptr.vmem [resolvable:$true] %s239_s12 }
  0x10   :  { %219 = vmatpush.bf16.msra.mxu1 %v331_v2  ;;  %v329_v5 = vld [vmem:[#allocation7 + $0x28] sm:$0xff]  ;;  %v320_v6 = vld [vmem:[#allocation5 + $0x20] sm:$0xff]  ;;  %v319_v8 = vld [vmem:[#allocation5 + $0x18] sm:$0xff] }
  0x11   :  { %v328_v7 = vld [vmem:[#allocation7 + $0x20] sm:$0xff]  ;;  %v327_v9 = vld [vmem:[#allocation7 + $0x18] sm:$0xff]  ;;  %v318_v10 = vld [vmem:[#allocation5 + $0x10] sm:$0xff] }
  0x12   :  { %v326_v11 = vld [vmem:[#allocation7 + $0x10] sm:$0xff]  ;;  %v317_v12 = vld [vmem:[#allocation5 + $0x8] sm:$0xff]  ;;  %v316_v13 = vld [vmem:[#allocation5] sm:$0xff] }
  0x13   :  { %137 = vmatpush.bf16.msra.mxu0 %v322_v1  ;;  %v66_v14 = vld [vmem:[#allocation2] sm:$0xff]  ;;  %v325_v16 = vld [vmem:[#allocation7 + $0x8] sm:$0xff]  ;;  %v324_v17 = vld [vmem:[#allocation7] sm:$0xff] }
  0x14   :  { %220 = vmatpush.bf16.msra.mxu1 %v330_v3  ;;  %v84_v15 = vpack.c.bf16 %v66_v14, %v66_v14  ;;  %v338_v18 = vld [vmem:[%s498_s2] ss:$0 sm:$0xff] }
  0x15   :  { %v339_v24 = vld [vmem:[%s500_s4] ss:$0 sm:$0xff] }
  0x17   :  { %138 = vmatpush.bf16.msra.mxu0 %v321_v4 }
  0x18   :  { %221 = vmatpush.bf16.msra.mxu1 %v329_v5 }
  0x1b   :  { %139 = vmatpush.bf16.msra.mxu0 %v320_v6 }
  0x1c   :  { %222 = vmatpush.bf16.msra.mxu1 %v328_v7 }
  0x1f   :  { %140 = vmatpush.bf16.msra.mxu0 %v319_v8 }
  0x20   :  { %223 = vmatpush.bf16.msra.mxu1 %v327_v9 }
  0x23   :  { %141 = vmatpush.bf16.msra.mxu0 %v318_v10 }
  0x24   :  { %224 = vmatpush.bf16.msra.mxu1 %v326_v11 }
  0x27   :  { %142 = vmatpush.bf16.msra.mxu0 %v317_v12 }
  0x28   :  { %225 = vmatpush.bf16.msra.mxu1 %v325_v16 }
  0x2b   :  { %143 = vmatpush.bf16.msra.mxu0 %v316_v13 }
  0x2c   :  { %226 = vmatpush.bf16.msra.mxu1 %v324_v17 }
  0x2e   :  { %144 = vmatmul.bf16.vlgmr.msra.gmra.mxu0 %v84_v15 }
  0xab   :  { %v145_v19 = vpop.f32.mrf.mxu0 }
  0xac   :  { %v146_v20 = vadd.f32 %v338_v18, %v145_v19 }
  0xae   :  { %v149_v21 = vmax.f32 %v146_v20, 0.0 }
  0xb0   :  { %v167_v22 = vpack.c.bf16 %v149_v21, %v149_v21 }
  0xb2   :  { %227 = vmatmul.bf16.vlgmr.msra.gmra.mxu1 %v167_v22 }
  0xb3   :  { %v147_v23 = vpop.f32.mrf.mxu0 }
 0x12f   :  { %v228_v25 = vpop.f32.mrf.mxu1 }
 0x130   :  { %v229_v26 = vadd.f32 %v339_v24, %v228_v25 }
 0x132   :  { %v232_v27 = vmax.f32 %v229_v26, 0.0 }
 0x134   :  { %233 = vst [vmem:[#allocation8] sm:$0xff] %v232_v27 }
 0x135   :  { %244 = dma.vmem_to_hbm [thread:$0]  %s240_s12, 128, %s242_s15, [#allocation4]  }
 0x137   :  { %v230_v28 = vpop.f32.mrf.mxu1 }
 0x138   :  { %440 = dma.done.wait [#allocation4], 128  }
 0x139   :  { %441 = vsyncadd [#allocation4], 4294967168 }
 0x13a   :  { %249 = vsyncpa [#allocation3], 1 }
 0x13b   :  { %250 = vsyncpa [#allocation6], 1 }
 0x13c   :  { %251 = vsyncpa [#allocation4], 1 }

</bundles_post_ra>
